<compile_context>
chip_gen: v7x
topology: tpu7x:2x2x1
jax: 0.10.0
libtpu: 0.0.40
codegen_flags: <defaults>
</compile_context>

<pallas_src>
import functools

import jax
import jax.numpy as jnp
from jax.experimental import pallas as pl
from jax.experimental.pallas import tpu as pltpu

EPS = 1e-5


def _round_up(a, b):
    return (a + b - 1) // b * b


def _prenorm_kernel(x_ref, w_ref, b_ref, o_ref, xn_ref, *, inv_d):
    # x_ref:  (tm, Dp) rows (feature-padded with zeros)
    # w_ref:  (Dp, tn) column tile of the gamma-folded weight
    # b_ref:  (1, tn)  column tile of the folded bias (f32)
    # o_ref:  (tm, tn) output tile
    # xn_ref: (tm, Dp) VMEM scratch caching normalized rows across column tiles
    j = pl.program_id(1)

    @pl.when(j == 0)
    def _():
        x = x_ref[...].astype(jnp.float32)
        # Single fused pass: sum and sum-of-squares.  Padded lanes are zero, so
        # dividing by the true feature dim gives the exact mean / E[x^2].
        s1 = jnp.sum(x, axis=-1, keepdims=True)
        s2 = jnp.sum(x * x, axis=-1, keepdims=True)
        mean = s1 * inv_d
        var = jnp.maximum(s2 * inv_d - mean * mean, 0.0)  # biased var, like torch
        xn = (x - mean) * jax.lax.rsqrt(var + EPS)
        # Padded feature lanes of xn are (-mean*rsqrt) but multiply zero weight
        # rows in the matmul, so the result stays exact.
        xn_ref[...] = xn.astype(xn_ref.dtype)

    out = jnp.dot(xn_ref[...], w_ref[...], preferred_element_type=jnp.float32)
    o_ref[...] = (out + b_ref[...]).astype(o_ref.dtype)


def prenorm(x, gamma, beta, w, wb, *, tm=256, tn=512, compute_dtype=None):
    """fn(LayerNorm(x)) with fn = Linear(w, wb).  x: (B, S, D)."""
    B, S, D = x.shape
    N = B * S
    cdt = jnp.dtype(compute_dtype) if compute_dtype is not None else x.dtype

    # ---- Fold LayerNorm affine into the Linear (exact algebra, done once) ----
    w_eff = gamma[:, None].astype(jnp.float32) * w.astype(jnp.float32)
    b_eff = beta.astype(jnp.float32) @ w.astype(jnp.float32) + wb.astype(jnp.float32)

    # ---- Pad to lane-dense / sublane-aligned shapes ----
    Dp = _round_up(max(D, 128), 128)
    tm = _round_up(min(tm, _round_up(N, 16)), 16)     # mult of 16: bf16-safe sublanes
    Np = _round_up(N, tm)
    tn = max(128, (min(tn, Dp) // 128) * 128)
    while Dp % tn != 0:
        tn -= 128

    x2 = x.reshape(N, D)
    xp = jnp.pad(x2, ((0, Np - N), (0, Dp - D)))
    wp = jnp.pad(w_eff.astype(cdt), ((0, Dp - D), (0, Dp - D)))
    bp = jnp.pad(b_eff.reshape(1, D).astype(jnp.float32), ((0, 0), (0, Dp - D)))

    # ---- VMEM budget (double-buffered tiles + xn scratch), capped for v7x ----
    xbytes = jnp.dtype(x.dtype).itemsize
    cbytes = jnp.dtype(cdt).itemsize
    need = (2 * tm * Dp * xbytes          # x tiles
            + 2 * tm * tn * xbytes        # out tiles
            + 2 * Dp * tn * cbytes        # weight tiles
            + 2 * tn * 4                  # bias tiles
            + tm * Dp * cbytes)           # xn scratch
    vmem_limit = int(min(64 * 1024 * 1024, max(32 * 1024 * 1024, 2 * need)))

    cost = pl.CostEstimate(
        flops=2 * Np * Dp * Dp,
        transcendentals=Np,
        bytes_accessed=Np * Dp * xbytes * 2 + Dp * Dp * cbytes + Dp * 4,
    )

    out = pl.pallas_call(
        functools.partial(_prenorm_kernel, inv_d=1.0 / D),
        out_shape=jax.ShapeDtypeStruct((Np, Dp), x.dtype),
        grid_spec=pltpu.PrefetchScalarGridSpec(
            num_scalar_prefetch=0,
            grid=(Np // tm, Dp // tn),
            in_specs=[
                pl.BlockSpec((tm, Dp), lambda i, j: (i, 0)),   # x rows (reused across j)
                pl.BlockSpec((Dp, tn), lambda i, j: (0, j)),   # folded weight column tile
                pl.BlockSpec((1, tn), lambda i, j: (0, j)),    # folded bias column tile
            ],
            out_specs=pl.BlockSpec((tm, tn), lambda i, j: (i, j)),
            scratch_shapes=[pltpu.VMEM((tm, Dp), cdt)],        # cached normalized rows
        ),
        compiler_params=pltpu.CompilerParams(
            dimension_semantics=("parallel", "arbitrary"),
            vmem_limit_bytes=vmem_limit,
        ),
        cost_estimate=cost,
    )(xp, wp, bp)

    return out[:N, :D].reshape(B, S, D)


def prenorm_ref(x, gamma, beta, w, wb):
    x32 = x.astype(jnp.float32)
    mean = jnp.mean(x32, axis=-1, keepdims=True)
    var = jnp.mean((x32 - mean) ** 2, axis=-1, keepdims=True)
    xn = (x32 - mean) * jax.lax.rsqrt(var + EPS)
    y = xn * gamma.astype(jnp.float32) + beta.astype(jnp.float32)
    return (y @ w.astype(jnp.float32) + wb.astype(jnp.float32)).astype(x.dtype)


if __name__ == "__main__":
    key = jax.random.PRNGKey(0)
    B, S, D = 2, 8, 32
    kx, kw, kb, kg, kbe = jax.random.split(key, 5)

    x = jax.random.normal(kx, (B, S, D), dtype=jnp.float32)
    # LayerNorm affine (perturbed away from identity to exercise the fold).
    gamma = 1.0 + 0.1 * jax.random.normal(kg, (D,), dtype=jnp.float32)
    beta = 0.1 * jax.random.normal(kbe, (D,), dtype=jnp.float32)
    # fn = Linear(D, D), deterministic init.
    w = jax.random.normal(kw, (D, D), dtype=jnp.float32) * 0.02
    wb = jax.random.normal(kb, (D,), dtype=jnp.float32) * 0.01

    out = prenorm(x, gamma, beta, w, wb)
    out = jax.block_until_ready(out)

    ref = prenorm_ref(x, gamma, beta, w, wb)
    assert out.shape == (B, S, D)
    assert jnp.allclose(out, ref, atol=1e-4, rtol=1e-4), "mismatch vs reference"

    print("KERNEL_OK")
</pallas_src>

<mosaic_0001>
module attributes {stable_mosaic.version = 11 : i64} {
  func.func @_prenorm_kernel(%arg0: i32, %arg1: i32, %arg2: memref<16x128xf32, #tpu.memory_space<vmem>>, %arg3: memref<128x128xf32, #tpu.memory_space<vmem>>, %arg4: memref<1x128xf32, #tpu.memory_space<vmem>>, %arg5: memref<16x128xf32, #tpu.memory_space<vmem>>, %arg6: memref<16x128xf32, #tpu.memory_space<vmem>>) attributes {dimension_semantics = [#tpu.dimension_semantics<parallel>, #tpu.dimension_semantics<arbitrary>], iteration_bounds = array<i64: 1, 1>, scalar_prefetch = 0 : i64, scratch_operands = 1 : i64, tpu.core_type = #tpu.core_type<tc>, window_params = [{transform_indices = @transform_0, window_bounds = array<i64: 16, 128>}, {transform_indices = @transform_1, window_bounds = array<i64: 128, 128>}, {transform_indices = @transform_2, window_bounds = array<i64: 1, 128>}, {transform_indices = @transform_3, window_bounds = array<i64: 16, 128>}]} {
    %c0_i32 = arith.constant 0 : i32
    %0 = arith.cmpi eq, %arg1, %c0_i32 : i32
    %1 = arith.extui %0 : i1 to i32
    %c0_i32_0 = arith.constant 0 : i32
    %2 = arith.cmpi ne, %1, %c0_i32_0 : i32
    scf.if %2 {
      %c0_8 = arith.constant 0 : index
      %c0_9 = arith.constant 0 : index
      %10 = vector.load %arg2[%c0_8, %c0_9] : memref<16x128xf32, #tpu.memory_space<vmem>>, vector<16x128xf32>
      %cst_10 = arith.constant dense<0.000000e+00> : vector<16xf32>
      %11 = vector.multi_reduction <add>, %10, %cst_10 [1] : vector<16x128xf32> to vector<16xf32>
      %12 = vector.shape_cast %11 : vector<16xf32> to vector<16x1xf32>
      %13 = arith.mulf %10, %10 : vector<16x128xf32>
      %cst_11 = arith.constant dense<0.000000e+00> : vector<16xf32>
      %14 = vector.multi_reduction <add>, %13, %cst_11 [1] : vector<16x128xf32> to vector<16xf32>
      %15 = vector.shape_cast %14 : vector<16xf32> to vector<16x1xf32>
      %cst_12 = arith.constant 3.125000e-02 : f32
      %16 = vector.broadcast %cst_12 : f32 to vector<16x1xf32>
      %17 = arith.mulf %12, %16 : vector<16x1xf32>
      %cst_13 = arith.constant 3.125000e-02 : f32
      %18 = vector.broadcast %cst_13 : f32 to vector<16x1xf32>
      %19 = arith.mulf %15, %18 : vector<16x1xf32>
      %20 = arith.mulf %17, %17 : vector<16x1xf32>
      %21 = arith.subf %19, %20 : vector<16x1xf32>
      %cst_14 = arith.constant 0.000000e+00 : f32
      %22 = vector.broadcast %cst_14 : f32 to vector<16x1xf32>
      %23 = arith.maximumf %21, %22 : vector<16x1xf32>
      %24 = vector.broadcast %17 : vector<16x1xf32> to vector<16x128xf32>
      %25 = arith.subf %10, %24 : vector<16x128xf32>
      %cst_15 = arith.constant 9.99999974E-6 : f32
      %26 = vector.broadcast %cst_15 : f32 to vector<16x1xf32>
      %27 = arith.addf %23, %26 : vector<16x1xf32>
      %28 = math.rsqrt %27 : vector<16x1xf32>
      %29 = vector.broadcast %28 : vector<16x1xf32> to vector<16x128xf32>
      %30 = arith.mulf %25, %29 : vector<16x128xf32>
      %c0_16 = arith.constant 0 : index
      %c0_17 = arith.constant 0 : index
      %31 = vector.load %arg6[%c0_16, %c0_17] : memref<16x128xf32, #tpu.memory_space<vmem>>, vector<16x128xf32>
      tpu.vector_store %arg6[%c0_16, %c0_17], %30 {strides = array<i32>} : memref<16x128xf32, #tpu.memory_space<vmem>>, vector<16x128xf32>,
    } else {
    }
    %c0 = arith.constant 0 : index
    %c0_1 = arith.constant 0 : index
    %3 = vector.load %arg6[%c0, %c0_1] : memref<16x128xf32, #tpu.memory_space<vmem>>, vector<16x128xf32>
    %c0_2 = arith.constant 0 : index
    %c0_3 = arith.constant 0 : index
    %4 = vector.load %arg3[%c0_2, %c0_3] : memref<128x128xf32, #tpu.memory_space<vmem>>, vector<128x128xf32>
    %cst = arith.constant dense<0.000000e+00> : vector<16x128xf32>
    %5 = tpu.matmul %3, %4, %cst {dimension_numbers = #tpu.dot_dimension_numbers<[1], [0], [0], [1], [0, 0, 1, 1], [], []>} : vector<16x128xf32>, vector<128x128xf32>, vector<16x128xf32> -> vector<16x128xf32>
    %c0_4 = arith.constant 0 : index
    %c0_5 = arith.constant 0 : index
    %6 = vector.load %arg4[%c0_4, %c0_5] : memref<1x128xf32, #tpu.memory_space<vmem>>, vector<1x128xf32>
    %7 = vector.broadcast %6 : vector<1x128xf32> to vector<16x128xf32>
    %8 = arith.addf %5, %7 : vector<16x128xf32>
    %c0_6 = arith.constant 0 : index
    %c0_7 = arith.constant 0 : index
    %9 = vector.load %arg5[%c0_6, %c0_7] : memref<16x128xf32, #tpu.memory_space<vmem>>, vector<16x128xf32>
    tpu.vector_store %arg5[%c0_6, %c0_7], %8 {strides = array<i32>} : memref<16x128xf32, #tpu.memory_space<vmem>>, vector<16x128xf32>,
    return
  }
  func.func @transform_0(%arg0: i32, %arg1: i32) -> (i32, i32) {
    %c0_i32 = arith.constant 0 : i32
    %c0_i32_0 = arith.constant 0 : i32
    return %arg0, %c0_i32 : i32, i32
  }
  func.func @transform_1(%arg0: i32, %arg1: i32) -> (i32, i32) {
    %c0_i32 = arith.constant 0 : i32
    %c0_i32_0 = arith.constant 0 : i32
    return %c0_i32, %arg1 : i32, i32
  }
  func.func @transform_2(%arg0: i32, %arg1: i32) -> (i32, i32) {
    %c0_i32 = arith.constant 0 : i32
    %c0_i32_0 = arith.constant 0 : i32
    return %c0_i32, %arg1 : i32, i32
  }
  func.func @transform_3(%arg0: i32, %arg1: i32) -> (i32, i32) {
    %c0_i32 = arith.constant 0 : i32
    return %arg0, %arg1 : i32, i32
  }
}

</mosaic_0001>

<bundles_post_ra>
// kernel: tpu_custom_call.1
= control target key start
LH: loop header
LB: loop body
LE: loop exit
PB: predicated region body
PF: predicated region fallthrough
CT: control target
= control target key end

     0   :  { %8 = vsyncpa [#allocation4], 0  ;;  %s451_s0 = inlined_call_operand.hbm [shape: f32[16,128], index: 0, kind: input, shape index: {}]   ;;  %s452_s1 = inlined_call_operand.hbm [shape: f32[128,128], index: 1, kind: input, shape index: {}]   ;;  %s453_s2 = inlined_call_operand.vmem [shape: f32[1,128], index: 2, kind: input, shape index: {}]   ;;  %s454_s3 = inlined_call_operand.hbm [shape: f32[16,128], index: 3, kind: output, shape index: {}]  }
   0x1   :  { %9 = vsyncpa [#allocation7], 0 }
   0x2   :  { %10 = vsyncpa [#allocation5], 0  ;;  %s366_s12 = smov [#allocation3]   ;;  %s294_s16 = scalar_lea.hbm %s451_s0, 256 }
   0x3   :  { %s16_s13 = sshll.u32 %s366_s12, 4  ;;  %p295_p0 = scmp.ne.s32.totalorder %s451_s0, %s294_s16  ;;  %s17_s13 = int_to_ptr.vmem [resolvable:$true] %s16_s13 }
   0x4   :  { %p298_p1 = scmp.lt.u32.totalorder %s294_s16, %s451_s0 }
   0x6   :  { %p300_p2 = pnand %p298_p1, %p295_p0 }
   0x8   :  { %303 = shalt.err (!%p300_p2)
}
   0x9   :  { %s304_s21 = scalar_lea.vmem %s17_s13, 256  ;;  %p309_p4 = scmp.lt.s32.totalorder %s17_s13, %s17_s13 }
   0xa   :  { %p305_p3 = scmp.ne.s32.totalorder %s17_s13, %s304_s21  ;;  %p310_p5 = scmp.lt.s32.totalorder %s304_s21, %s304_s21 }
   0xc   :  { %p311_p6 = por %p310_p5, %p309_p4 }
   0xe   :  { %p312_p7 = pnand %p311_p6, %p305_p3 }
  0x10   :  { %315 = shalt.err (!%p312_p7)
}
  0x11   :  { %s367_s22 = smov 128   ;;  %s368_s23 = smov 8  }
  0x12   :  { %22 = dma.hbm_to_vmem [thread:$0]  %s451_s0, 256, %s17_s13, [#allocation4], %s367_s22, %s367_s22, %s368_s23  }
  0x13   :  { %s369_s26 = smov [#allocation6]   ;;  %s316_s30 = scalar_lea.hbm %s452_s1, 2048 }
  0x14   :  { %s28_s27 = sshll.u32 %s369_s26, 4  ;;  %p317_p8 = scmp.ne.s32.totalorder %s452_s1, %s316_s30  ;;  %s29_s27 = int_to_ptr.vmem [resolvable:$true] %s28_s27 }
  0x15   :  { %p320_p9 = scmp.lt.u32.totalorder %s316_s30, %s452_s1 }
  0x17   :  { %p322_p10 = pnand %p320_p9, %p317_p8 }
  0x19   :  { %325 = shalt.err (!%p322_p10)
}
  0x1a   :  { %s326_s8 = scalar_lea.vmem %s29_s27, 2048  ;;  %p331_p12 = scmp.lt.s32.totalorder %s29_s27, %s29_s27 }
  0x1b   :  { %p327_p11 = scmp.ne.s32.totalorder %s29_s27, %s326_s8  ;;  %p332_p13 = scmp.lt.s32.totalorder %s326_s8, %s326_s8 }
  0x1d   :  { %p333_p0 = por %p332_p13, %p331_p12 }
  0x1f   :  { %p334_p1 = pnand %p333_p0, %p327_p11 }
  0x21   :  { %337 = shalt.err (!%p334_p1)
}
  0x22   :  { %34 = dma.hbm_to_vmem [thread:$0]  %s452_s1, 2048, %s29_s27, [#allocation7], %s367_s22, %s367_s22, %s368_s23  }
  0x23   :  { %360 = dma.done.wait [#allocation4], 256  }
  0x24   :  { %361 = vsyncadd [#allocation4], 4294967040 }
  0x25   :  { %362 = dma.done.wait [#allocation7], 2048  }
  0x26   :  { %363 = vsyncadd [#allocation7], 4294965248  ;;  %v421_v0 = vld [vmem:[#allocation3] sm:$0xff]  ;;  %v423_v1 = vld [vmem:[#allocation3 + $0x8] sm:$0xff]  ;;  %s370_s11 = smov [#allocation8]  }
  0x27   :  { %v81_v2 = vld [vmem:[#allocation6] sm:$0xff]  ;;  %49 = vadd.xlane.f32.xlu0 %v421_v0  ;;  %v53_v3 = vmul.f32 %v421_v0, %v421_v0  ;;  %v82_v4 = vld [vmem:[#allocation6 + $0x8] sm:$0xff]  ;;  %v83_v5 = vld [vmem:[#allocation6 + $0x10] sm:$0xff]  ;;  %v54_v9 = vmul.f32 %v423_v1, %v423_v1  ;;  %s186_s12 = sshll.u32 %s370_s11, 4  ;;  %s187_s12 = int_to_ptr.vmem [resolvable:$true] %s186_s12 }
  0x28   :  { %v84_v6 = vld [vmem:[#allocation6 + $0x18] sm:$0xff]  ;;  %v253_v7 = vpack.c.bf16 %v82_v4, %v81_v2  ;;  %v85_v10 = vld [vmem:[#allocation6 + $0x20] sm:$0xff]  ;;  %v86_v11 = vld [vmem:[#allocation6 + $0x28] sm:$0xff]  ;;  %s338_s13 = scalar_lea.vmem %s187_s12, 256  ;;  %p343_p3 = scmp.lt.s32.totalorder %s187_s12, %s187_s12 }
  0x29   :  { %v257_v8 = vpack.c.bf16 %v84_v6, %v83_v5  ;;  %55 = vadd.xlane.f32.xlu1 %v53_v3  ;;  %v261_v12 = vpack.c.bf16 %v86_v11, %v85_v10  ;;  %v87_v13 = vld [vmem:[#allocation6 + $0x30] sm:$0xff]  ;;  %v88_v14 = vld [vmem:[#allocation6 + $0x38] sm:$0xff]  ;;  %v89_v16 = vld [vmem:[#allocation6 + $0x40] sm:$0xff]  ;;  %p339_p2 = scmp.ne.s32.totalorder %s187_s12, %s338_s13  ;;  %p344_p4 = scmp.lt.s32.totalorder %s338_s13, %s338_s13 }
  0x2a   :  { %254 = vmatprep.subr.bf16.mxu0 %v253_v7  ;;  %v265_v15 = vpack.c.bf16 %v88_v14, %v87_v13  ;;  %v90_v17 = vld [vmem:[#allocation6 + $0x48] sm:$0xff]  ;;  %v91_v19 = vld [vmem:[#allocation6 + $0x50] sm:$0xff]  ;;  %v92_v20 = vld [vmem:[#allocation6 + $0x58] sm:$0xff] }
  0x2b   :  { %51 = vadd.xlane.f32.xlu0 %v423_v1  ;;  %256 = vmatpush3.bf16.msra.mxu0 %v253_v7  ;;  %v269_v18 = vpack.c.bf16 %v90_v17, %v89_v16  ;;  %v273_v21 = vpack.c.bf16 %v92_v20, %v91_v19  ;;  %v93_v22 = vld [vmem:[#allocation6 + $0x60] sm:$0xff]  ;;  %v94_v23 = vld [vmem:[#allocation6 + $0x68] sm:$0xff]  ;;  %v95_v24 = vld [vmem:[#allocation6 + $0x70] sm:$0xff]  ;;  %p345_p5 = por %p344_p4, %p343_p3 }
  0x2c   :  { %258 = vmatprep.subr.bf16.mxu0 %v257_v8  ;;  %v277_v25 = vpack.c.bf16 %v94_v23, %v93_v22  ;;  %v96_v26 = vld [vmem:[#allocation6 + $0x78] sm:$0xff]  ;;  %v199_v50 = vld [vmem:[%s453_s2] ss:$0 sm:$0xff] }
  0x2d   :  { %57 = vadd.xlane.f32.xlu1 %v54_v9  ;;  %v281_v27 = vpack.c.bf16 %v96_v26, %v95_v24  ;;  %p346_p6 = pnand %p345_p5, %p339_p2 }
  0x2f   :  { %260 = vmatpush3.bf16.msra.mxu0 %v257_v8 }
  0x30   :  { %262 = vmatprep.subr.bf16.mxu0 %v261_v12 }
  0x33   :  { %264 = vmatpush3.bf16.msra.mxu0 %v261_v12 }
  0x34   :  { %266 = vmatprep.subr.bf16.mxu0 %v265_v15 }
  0x37   :  { %268 = vmatpush3.bf16.msra.mxu0 %v265_v15 }
  0x38   :  { %270 = vmatprep.subr.bf16.mxu0 %v269_v18 }
  0x3b   :  { %272 = vmatpush3.bf16.msra.mxu0 %v269_v18 }
  0x3c   :  { %274 = vmatprep.subr.bf16.mxu0 %v273_v21 }
  0x3f   :  { %276 = vmatpush3.bf16.msra.mxu0 %v273_v21 }
  0x40   :  { %278 = vmatprep.subr.bf16.mxu0 %v277_v25 }
  0x43   :  { %280 = vmatpush3.bf16.msra.mxu0 %v277_v25 }
  0x44   :  { %282 = vmatprep.subr.bf16.mxu0 %v281_v27 }
  0x47   :  { %284 = vmatpush3.bf16.msra.mxu0 %v281_v27 }
  0xb4   :  { %v50_v28 = vpop.xlane.xlu0 %49 }
  0xb5   :  { %v59_v29 = vmul.f32 0.03125, %v50_v28 }
  0xb6   :  { %v56_v30 = vpop.xlane.xlu1 %55 }
  0xb7   :  { %v63_v31 = vmul.f32 %v59_v29, %v59_v29  ;;  %v61_v32 = vmul.f32 0.03125, %v56_v30  ;;  %v69_v44 = vsub.f32 %v421_v0, %v59_v29 }
  0xb8   :  { %v52_v33 = vpop.xlane.xlu0 %51 }
  0xb9   :  { %v65_v34 = vsub.f32 %v61_v32, %v63_v31  ;;  %v60_v35 = vmul.f32 0.03125, %v52_v33 }
  0xba   :  { %v58_v36 = vpop.xlane.xlu1 %57 }
  0xbb   :  { %v67_v37 = vmax.f32 %v65_v34, 0.0  ;;  %v64_v38 = vmul.f32 %v60_v35, %v60_v35  ;;  %v62_v39 = vmul.f32 0.03125, %v58_v36  ;;  %v70_v47 = vsub.f32 %v423_v1, %v60_v35 }
  0xbd   :  { %v71_v40 = vadd.f32 1e-05, %v67_v37  ;;  %v66_v41 = vsub.f32 %v62_v39, %v64_v38 }
  0xbf   :  { %290 = vrsqrt.f32 %v71_v40  ;;  %v68_v42 = vmax.f32 %v66_v41, 0.0 }
  0xc1   :  { %v72_v43 = vadd.f32 1e-05, %v68_v42 }
  0xc3   :  { %292 = vrsqrt.f32 %v72_v43 }
  0xc9   :  { %v291_v45 = vpop.eup %290 }
  0xca   :  { %v75_v46 = vmul.f32 %v291_v45, %v69_v44 }
  0xcc   :  { %250 = vmatprep.mubr.f32.mxu0 %v75_v46 }
  0xcd   :  { %v293_v48 = vpop.eup %292 }
  0xce   :  { %v76_v49 = vmul.f32 %v293_v48, %v70_v47 }
  0xd0   :  { %251 = vmatmul.mubr.f32.vlgmr.msra.gmra.mrb[0].mxu0 %v76_v49 }
 0x1a3   :  { %v252_v51 = vpop.f32.mrb[0].mxu0 }
 0x1a4   :  { %v176_v52 = vadd.f32 %v252_v51, %v199_v50  ;;  %v170_v53 = vpop.f32.mrb[1].mxu0 }
 0x1a5   :  { %v171_v54 = vadd.f32 %v199_v50, %v170_v53 }
 0x1a6   :  { %180 = vst [vmem:[#allocation8 + $0x8] sm:$0xff] %v176_v52 }
 0x1a7   :  { %179 = vst [vmem:[#allocation8] sm:$0xff] %v171_v54 }
 0x1a8   :  { %349 = shalt.err (!%p346_p6)
}
 0x1a9   :  { %s350_s2 = scalar_lea.hbm %s454_s3, 256 }
 0x1aa   :  { %p351_p7 = scmp.ne.s32.totalorder %s454_s3, %s350_s2  ;;  %p354_p8 = scmp.lt.u32.totalorder %s350_s2, %s454_s3 }
 0x1ac   :  { %p356_p9 = pnand %p354_p8, %p351_p7 }
 0x1ae   :  { %359 = shalt.err (!%p356_p9)
}
 0x1af   :  { %192 = dma.vmem_to_hbm [thread:$0]  %s187_s12, 256, %s454_s3, [#allocation5], %s367_s22, %s367_s22, %s368_s23  }
 0x1b0   :  { %364 = dma.done.wait [#allocation5], 256  }
 0x1b1   :  { %365 = vsyncadd [#allocation5], 4294967040 }
 0x1b2   :  { %196 = vsyncpa [#allocation4], 1 }
 0x1b3   :  { %197 = vsyncpa [#allocation7], 1 }
 0x1b4   :  { %198 = vsyncpa [#allocation5], 1 }

</bundles_post_ra>
